<compile_context>
chip_gen: v7x
topology: tpu7x:2x2x1
jax: 0.10.0
libtpu: 0.0.40
codegen_flags: <defaults>
</compile_context>

<pallas_src>
import functools
import math

import jax
import jax.numpy as jnp
from jax import lax
from jax.experimental import pallas as pl
from jax.experimental.pallas import tpu as pltpu

LN_EPS = 1e-5  # PyTorch nn.LayerNorm default


def _ff_kernel(x_ref, w1_ref, b1_ref, w2_ref, b2_ref, o_ref,
               xh_ref, acc_ref, *, gelu_approximate):
    """Grid = (row_tiles, hidden_chunks); the hidden-chunk axis is the reduction."""
    k = pl.program_id(1)

    # ---- once per row tile: LayerNorm (one-pass f32 moments, biased var) ----
    # gamma/beta are pre-folded into W1/b1 by the wrapper.
    @pl.when(k == 0)
    def _():
        x = x_ref[...].astype(jnp.float32)
        inv_d = 1.0 / x.shape[-1]
        s1 = jnp.sum(x, axis=-1, keepdims=True)
        s2 = jnp.sum(x * x, axis=-1, keepdims=True)
        mean = s1 * inv_d
        var = jnp.maximum(s2 * inv_d - mean * mean, 0.0)
        xh_ref[...] = ((x - mean) * lax.rsqrt(var + LN_EPS)).astype(xh_ref.dtype)
        acc_ref[...] = jnp.zeros_like(acc_ref)

    # ---- Linear(dim -> tile_h chunk), MXU with f32 accumulation ----
    h = jnp.dot(xh_ref[...], w1_ref[...], preferred_element_type=jnp.float32)
    h = h + b1_ref[...]                       # folded bias, kept in f32

    # ---- GELU: exact erf by default (PyTorch nn.GELU); tanh approx opt-in ----
    if gelu_approximate:
        h = jax.nn.gelu(h, approximate=True)  # EUP tanh path (separate VLIW slot)
    else:
        h = 0.5 * h * (1.0 + lax.erf(h * (1.0 / math.sqrt(2.0))))

    # Dropout(p=0.0) is the identity -> no-op.

    # ---- Linear(tile_h chunk -> dim), accumulated over hidden chunks ----
    acc_ref[...] += jnp.dot(h.astype(w2_ref.dtype), w2_ref[...],
                            preferred_element_type=jnp.float32)

    # ---- finalize: add output bias, write back ----
    @pl.when(k == pl.num_programs(1) - 1)
    def _():
        o_ref[...] = (acc_ref[...] + b2_ref[...]).astype(o_ref.dtype)


@functools.lru_cache(maxsize=None)
def _vmem_capacity_bytes():
    """Per-core VMEM capacity; falls back to a v7x-safe 64 MiB."""
    default = 64 * 1024 * 1024
    try:
        info = pltpu.get_tpu_info()
    except Exception:
        return default
    for name in ("vmem_capacity_bytes", "vmem_bytes", "vmem_capacity"):
        cap = getattr(info, name, None)
        if cap:
            return int(cap)
    return default


def _auto_tiles(n, dim, hidden, isz_x, isz_w, isz_c, vmem_cap):
    """Pick (tile_n, tile_h) from the device VMEM budget (static shapes only)."""
    budget = min(int(vmem_cap * 0.8), 112 * 1024 * 1024)
    row_gran = 16 if min(isz_x, isz_c) < 4 else 8

    def w_bytes(th):        # double-buffered W1 + W2 chunks (+ b1 chunk)
        return 4 * dim * th * isz_w + 2 * th * 4

    def act_bytes(tn):      # x & out blocks (double-buffered) + xh/acc scratch
        return tn * dim * (4 * isz_x + isz_c + 4)

    # Hidden chunk: prefer resident weights (tile_h == hidden -> W1/W2 are
    # DMAed from HBM exactly once for the whole call).  On 64 MiB v7x large
    # dim*hidden falls back to the chunked path automatically.
    if w_bytes(hidden) <= 0.6 * budget or hidden <= 128:
        tile_h = hidden
    else:
        tile_h = None
        for th in range((hidden // 128) * 128, 0, -128):
            if hidden % th == 0 and w_bytes(th) <= 0.5 * budget:
                tile_h = th
                break
        if tile_h is None:
            tile_h = 128 if hidden % 128 == 0 else hidden

    remaining = budget - w_bytes(tile_h)

    # Row tile: as large as the remaining VMEM allows (up to 1024 rows), so the
    # kernel is MXU-bound rather than weight-streaming-bound on all parts.
    tile_n = None
    tn = min(1024, n)
    tn -= tn % row_gran
    while tn >= row_gran:
        if n % tn == 0 and act_bytes(tn) <= remaining:
            tile_n = tn
            break
        tn -= row_gran
    if tile_n is None:
        tile_n = n  # tiny problems: a single row tile

    # Dual-TC (v7x megacore) occupancy: with resident weights an extra row tile
    # costs no extra weight traffic, so prefer >= 2 row tiles when shapes allow.
    if tile_h == hidden and n // tile_n < 2:
        half = n // 2
        if half >= row_gran and half % row_gran == 0 and n % half == 0:
            tile_n = half
    return tile_n, tile_h


@functools.partial(jax.jit, static_argnames=("tile_n", "tile_h",
                                             "compute_dtype", "gelu_approximate"))
def feed_forward(x, gamma, beta, w1, b1, w2, b2, *, tile_n=None, tile_h=None,
                 compute_dtype=None, gelu_approximate=False):
    """x: (batch, seq, dim).  Returns (batch, seq, dim).

    Weights are (in_features, out_features) = PyTorch nn.Linear weights transposed.
    compute_dtype=jnp.bfloat16 casts weights once in the wrapper for the fast
    bf16 MXU path; f32 weights (the default here) are a slow-but-exact path.
    """
    batch, seq, dim = x.shape
    dim_in, hidden = w1.shape
    assert dim_in == dim and w2.shape == (hidden, dim)
    n = batch * seq

    cdt = jnp.dtype(compute_dtype) if compute_dtype is not None else jnp.dtype(w1.dtype)
    isz_x = jnp.dtype(x.dtype).itemsize
    isz_w = cdt.itemsize
    vmem_cap = _vmem_capacity_bytes()

    auto_n, auto_h = _auto_tiles(n, dim, hidden, isz_x, isz_w, cdt.itemsize, vmem_cap)
    tile_n = auto_n if tile_n is None else min(tile_n, n)
    tile_h = auto_h if tile_h is None else min(tile_h, hidden)

    row_gran = 16 if min(isz_x, cdt.itemsize) < 4 else 8
    assert n % tile_n == 0, "batch*seq must be divisible by tile_n"
    assert hidden % tile_h == 0, "hidden_dim must be divisible by tile_h"
    assert tile_n % row_gran == 0 or tile_n == n, \
        f"tile_n must be a multiple of {row_gran} (or equal batch*seq)"
    if tile_h != hidden:
        assert tile_h % 128 == 0, "tile_h must be a multiple of 128 (lane dim)"
    # NOTE: for real configs dim should be a multiple of 128 (lane-dense stores).

    # Fold the LayerNorm affine into the first linear (done once, in f32):
    #   (x_hat*gamma + beta) @ W1 + b1 == x_hat @ (gamma[:,None]*W1) + (b1 + beta@W1)
    w1f = gamma.astype(jnp.float32)[:, None] * w1.astype(jnp.float32)
    b1f = b1.astype(jnp.float32) + beta.astype(jnp.float32) @ w1.astype(jnp.float32)
    w1k = w1f.astype(cdt)
    w2k = w2.astype(cdt)
    b1k = b1f.reshape(1, hidden)                      # kept in f32
    b2k = b2.astype(jnp.float32).reshape(1, dim)      # kept in f32

    x2d = x.reshape(n, dim)
    grid = (n // tile_n, hidden // tile_h)
    k_steps = grid[1]

    # ---- VMEM actually used by this tiling (double-buffered blocks + scratch) ----
    blk_bytes = (4 * tile_n * dim * isz_x             # x tile + out tile
                 + 4 * dim * tile_h * isz_w           # W1 + W2 chunks
                 + 2 * (tile_h + dim) * 4)            # b1 chunk + b2
    scratch_bytes = tile_n * dim * (cdt.itemsize + 4)  # xh + f32 accumulator
    needed = blk_bytes + scratch_bytes
    vmem_limit = max(int(1.4 * needed), 32 * 1024 * 1024)
    vmem_limit = min(vmem_limit,
                     max(vmem_cap - 2 * 1024 * 1024, needed),
                     120 * 1024 * 1024)

    # Weights are re-streamed once per row tile only when the k axis is chunked.
    weight_passes = grid[0] if k_steps > 1 else 1
    cost = pl.CostEstimate(
        flops=4 * n * dim * hidden,                   # two matmuls
        transcendentals=n * hidden,                   # GELU
        bytes_accessed=(2 * n * dim * isz_x
                        + weight_passes * 2 * dim * hidden * isz_w
                        + (hidden + dim) * 4),
    )

    kernel = functools.partial(_ff_kernel, gelu_approximate=gelu_approximate)

    out2d = pl.pallas_call(
        kernel,
        out_shape=jax.ShapeDtypeStruct((n, dim), x.dtype),
        grid_spec=pltpu.PrefetchScalarGridSpec(
            num_scalar_prefetch=0,
            grid=grid,
            in_specs=[
                pl.BlockSpec((tile_n, dim), lambda i, k: (i, 0)),   # x tile
                pl.BlockSpec((dim, tile_h), lambda i, k: (0, k)),   # W1 chunk
                pl.BlockSpec((1, tile_h), lambda i, k: (0, k)),     # b1 chunk
                pl.BlockSpec((tile_h, dim), lambda i, k: (k, 0)),   # W2 chunk
                pl.BlockSpec((1, dim), lambda i, k: (0, 0)),        # b2
            ],
            out_specs=pl.BlockSpec((tile_n, dim), lambda i, k: (i, 0)),
            scratch_shapes=[
                pltpu.VMEM((tile_n, dim), cdt),          # x_hat (reused over k)
                pltpu.VMEM((tile_n, dim), jnp.float32),  # output accumulator
            ],
        ),
        compiler_params=pltpu.CompilerParams(
            dimension_semantics=("parallel", "arbitrary"),
            vmem_limit_bytes=int(vmem_limit),
        ),
        cost_estimate=cost,
    )(x2d, w1k, b1k, w2k, b2k)

    return out2d.reshape(batch, seq, dim)


def init_params(key, dim, hidden_dim, dtype=jnp.float32):
    """Deterministic synthetic parameters (shapes match the PyTorch module)."""
    kg, kb, k1, k2, k3, k4 = jax.random.split(key, 6)
    # Non-trivial LayerNorm affine so the gamma/beta -> W1/b1 fold is exercised.
    gamma = (1.0 + 0.1 * jax.random.normal(kg, (dim,))).astype(dtype)
    beta = (0.1 * jax.random.normal(kb, (dim,))).astype(dtype)
    # Linear(dim, hidden_dim): stored transposed -> (dim, hidden_dim)
    lim1 = 1.0 / math.sqrt(dim)
    w1 = jax.random.uniform(k1, (dim, hidden_dim), dtype, -lim1, lim1)
    b1 = jax.random.uniform(k2, (hidden_dim,), dtype, -lim1, lim1)
    # Linear(hidden_dim, dim): stored transposed -> (hidden_dim, dim)
    lim2 = 1.0 / math.sqrt(hidden_dim)
    w2 = jax.random.uniform(k3, (hidden_dim, dim), dtype, -lim2, lim2)
    b2 = jax.random.uniform(k4, (dim,), dtype, -lim2, lim2)
    return gamma, beta, w1, b1, w2, b2


def _reference(x, gamma, beta, w1, b1, w2, b2):
    xf = x.astype(jnp.float32)
    mean = jnp.mean(xf, axis=-1, keepdims=True)
    var = jnp.mean((xf - mean) ** 2, axis=-1, keepdims=True)
    xh = ((xf - mean) / jnp.sqrt(var + LN_EPS) * gamma.astype(jnp.float32)
          + beta.astype(jnp.float32))
    h = xh @ w1.astype(jnp.float32) + b1.astype(jnp.float32)
    h = 0.5 * h * (1.0 + lax.erf(h / math.sqrt(2.0)))
    y = h @ w2.astype(jnp.float32) + b2.astype(jnp.float32)
    return y.astype(x.dtype)


if __name__ == "__main__":
    key = jax.random.PRNGKey(0)
    kx, kp = jax.random.split(key)

    # Small but lane-dense test shapes (dim multiple of 128).
    batch, seq, dim, hidden_dim = 2, 8, 128, 256
    x = jax.random.normal(kx, (batch, seq, dim), jnp.float32)
    params = init_params(kp, dim, hidden_dim)
    ref = _reference(x, *params)

    # 1) auto-tiled path: VMEM-derived tiles (tile_h == hidden -> resident weights)
    out = jax.block_until_ready(feed_forward(x, *params))
    assert out.shape == (batch, seq, dim)
    err = float(jnp.max(jnp.abs(out - ref)))
    assert jnp.allclose(out, ref, atol=1e-3, rtol=1e-3), f"auto path max err {err}"

    # 2) chunked hidden reduction (grid=(1,2)) -> exercises the f32 accumulator path
    out_chunked = jax.block_until_ready(
        feed_forward(x, *params, tile_n=16, tile_h=128))
    err = float(jnp.max(jnp.abs(out_chunked - ref)))
    assert jnp.allclose(out_chunked, ref, atol=1e-3, rtol=1e-3), \
        f"chunked path max err {err}"

    # 3) bf16 MXU compute path (production fast path; mixed-precision tolerance)
    out_bf16 = jax.block_until_ready(
        feed_forward(x, *params, compute_dtype=jnp.bfloat16))
    err = float(jnp.max(jnp.abs(out_bf16.astype(jnp.float32) - ref)))
    assert err < 5e-2, f"bf16 path max err {err}"

    print("KERNEL_OK")
</pallas_src>

<mosaic_0001>
module attributes {stable_mosaic.version = 11 : i64} {
  func.func @_ff_kernel(%arg0: i32, %arg1: i32, %arg2: memref<8x128xf32, #tpu.memory_space<vmem>>, %arg3: memref<128x256xf32, #tpu.memory_space<vmem>>, %arg4: memref<1x256xf32, #tpu.memory_space<vmem>>, %arg5: memref<256x128xf32, #tpu.memory_space<vmem>>, %arg6: memref<1x128xf32, #tpu.memory_space<vmem>>, %arg7: memref<8x128xf32, #tpu.memory_space<vmem>>, %arg8: memref<8x128xf32, #tpu.memory_space<vmem>>, %arg9: memref<8x128xf32, #tpu.memory_space<vmem>>) attributes {dimension_semantics = [#tpu.dimension_semantics<parallel>, #tpu.dimension_semantics<arbitrary>], iteration_bounds = array<i64: 2, 1>, scalar_prefetch = 0 : i64, scratch_operands = 2 : i64, tpu.core_type = #tpu.core_type<tc>, window_params = [{transform_indices = @transform_0, window_bounds = array<i64: 8, 128>}, {transform_indices = @transform_1, window_bounds = array<i64: 128, 256>}, {transform_indices = @transform_2, window_bounds = array<i64: 1, 256>}, {transform_indices = @transform_3, window_bounds = array<i64: 256, 128>}, {pipeline_mode = #tpu.pipeline_mode<synchronous>, transform_indices = @transform_4, window_bounds = array<i64: 1, 128>}, {transform_indices = @transform_5, window_bounds = array<i64: 8, 128>}]} {
    %c0_i32 = arith.constant 0 : i32
    %0 = arith.cmpi eq, %arg1, %c0_i32 : i32
    %1 = arith.extui %0 : i1 to i32
    %c0_i32_0 = arith.constant 0 : i32
    %2 = arith.cmpi ne, %1, %c0_i32_0 : i32
    scf.if %2 {
      %c0_18 = arith.constant 0 : index
      %c0_19 = arith.constant 0 : index
      %25 = vector.load %arg2[%c0_18, %c0_19] : memref<8x128xf32, #tpu.memory_space<vmem>>, vector<8x128xf32>
      %cst_20 = arith.constant dense<0.000000e+00> : vector<8xf32>
      %26 = vector.multi_reduction <add>, %25, %cst_20 [1] : vector<8x128xf32> to vector<8xf32>
      %27 = vector.shape_cast %26 : vector<8xf32> to vector<8x1xf32>
      %28 = arith.mulf %25, %25 : vector<8x128xf32>
      %cst_21 = arith.constant dense<0.000000e+00> : vector<8xf32>
      %29 = vector.multi_reduction <add>, %28, %cst_21 [1] : vector<8x128xf32> to vector<8xf32>
      %30 = vector.shape_cast %29 : vector<8xf32> to vector<8x1xf32>
      %cst_22 = arith.constant 7.812500e-03 : f32
      %31 = vector.broadcast %cst_22 : f32 to vector<8x1xf32>
      %32 = arith.mulf %27, %31 : vector<8x1xf32>
      %cst_23 = arith.constant 7.812500e-03 : f32
      %33 = vector.broadcast %cst_23 : f32 to vector<8x1xf32>
      %34 = arith.mulf %30, %33 : vector<8x1xf32>
      %35 = arith.mulf %32, %32 : vector<8x1xf32>
      %36 = arith.subf %34, %35 : vector<8x1xf32>
      %cst_24 = arith.constant 0.000000e+00 : f32
      %37 = vector.broadcast %cst_24 : f32 to vector<8x1xf32>
      %38 = arith.maximumf %36, %37 : vector<8x1xf32>
      %39 = vector.broadcast %32 : vector<8x1xf32> to vector<8x128xf32>
      %40 = arith.subf %25, %39 : vector<8x128xf32>
      %cst_25 = arith.constant 9.99999974E-6 : f32
      %41 = vector.broadcast %cst_25 : f32 to vector<8x1xf32>
      %42 = arith.addf %38, %41 : vector<8x1xf32>
      %43 = math.rsqrt %42 : vector<8x1xf32>
      %44 = vector.broadcast %43 : vector<8x1xf32> to vector<8x128xf32>
      %45 = arith.mulf %40, %44 : vector<8x128xf32>
      %c0_26 = arith.constant 0 : index
      %c0_27 = arith.constant 0 : index
      %46 = vector.load %arg8[%c0_26, %c0_27] : memref<8x128xf32, #tpu.memory_space<vmem>>, vector<8x128xf32>
      tpu.vector_store %arg8[%c0_26, %c0_27], %45 {strides = array<i32>} : memref<8x128xf32, #tpu.memory_space<vmem>>, vector<8x128xf32>,
      %cst_28 = arith.constant 0.000000e+00 : f32
      %47 = vector.broadcast %cst_28 : f32 to vector<8x128xf32>
      %c0_29 = arith.constant 0 : index
      %c0_30 = arith.constant 0 : index
      %48 = vector.load %arg9[%c0_29, %c0_30] : memref<8x128xf32, #tpu.memory_space<vmem>>, vector<8x128xf32>
      tpu.vector_store %arg9[%c0_29, %c0_30], %47 {strides = array<i32>} : memref<8x128xf32, #tpu.memory_space<vmem>>, vector<8x128xf32>,
    } else {
    }
    %c0 = arith.constant 0 : index
    %c0_1 = arith.constant 0 : index
    %3 = vector.load %arg8[%c0, %c0_1] : memref<8x128xf32, #tpu.memory_space<vmem>>, vector<8x128xf32>
    %c0_2 = arith.constant 0 : index
    %c0_3 = arith.constant 0 : index
    %4 = vector.load %arg3[%c0_2, %c0_3] : memref<128x256xf32, #tpu.memory_space<vmem>>, vector<128x256xf32>
    %cst = arith.constant dense<0.000000e+00> : vector<8x256xf32>
    %5 = tpu.matmul %3, %4, %cst {dimension_numbers = #tpu.dot_dimension_numbers<[1], [0], [0], [1], [0, 0, 1, 1], [], []>} : vector<8x128xf32>, vector<128x256xf32>, vector<8x256xf32> -> vector<8x256xf32>
    %c0_4 = arith.constant 0 : index
    %c0_5 = arith.constant 0 : index
    %6 = vector.load %arg4[%c0_4, %c0_5] : memref<1x256xf32, #tpu.memory_space<vmem>>, vector<1x256xf32>
    %7 = vector.broadcast %6 : vector<1x256xf32> to vector<8x256xf32>
    %8 = arith.addf %5, %7 : vector<8x256xf32>
    %cst_6 = arith.constant 5.000000e-01 : f32
    %9 = vector.broadcast %cst_6 : f32 to vector<8x256xf32>
    %10 = arith.mulf %9, %8 : vector<8x256xf32>
    %cst_7 = arith.constant 0.707106769 : f32
    %11 = vector.broadcast %cst_7 : f32 to vector<8x256xf32>
    %12 = arith.mulf %8, %11 : vector<8x256xf32>
    %13 = math.erf %12 : vector<8x256xf32>
    %cst_8 = arith.constant 1.000000e+00 : f32
    %14 = vector.broadcast %cst_8 : f32 to vector<8x256xf32>
    %15 = arith.addf %14, %13 : vector<8x256xf32>
    %16 = arith.mulf %10, %15 : vector<8x256xf32>
    %c0_9 = arith.constant 0 : index
    %c0_10 = arith.constant 0 : index
    %17 = vector.load %arg9[%c0_9, %c0_10] : memref<8x128xf32, #tpu.memory_space<vmem>>, vector<8x128xf32>
    %c0_11 = arith.constant 0 : index
    %c0_12 = arith.constant 0 : index
    %18 = vector.load %arg5[%c0_11, %c0_12] : memref<256x128xf32, #tpu.memory_space<vmem>>, vector<256x128xf32>
    %cst_13 = arith.constant dense<0.000000e+00> : vector<8x128xf32>
    %19 = tpu.matmul %16, %18, %cst_13 {dimension_numbers = #tpu.dot_dimension_numbers<[1], [0], [0], [1], [0, 0, 1, 1], [], []>} : vector<8x256xf32>, vector<256x128xf32>, vector<8x128xf32> -> vector<8x128xf32>
    %20 = arith.addf %17, %19 : vector<8x128xf32>
    %c0_14 = arith.constant 0 : index
    %c0_15 = arith.constant 0 : index
    %21 = vector.load %arg9[%c0_14, %c0_15] : memref<8x128xf32, #tpu.memory_space<vmem>>, vector<8x128xf32>
    tpu.vector_store %arg9[%c0_14, %c0_15], %20 {strides = array<i32>} : memref<8x128xf32, #tpu.memory_space<vmem>>, vector<8x128xf32>,
    %c0_i32_16 = arith.constant 0 : i32
    %22 = arith.cmpi eq, %arg1, %c0_i32_16 : i32
    %23 = arith.extui %22 : i1 to i32
    %c0_i32_17 = arith.constant 0 : i32
    %24 = arith.cmpi ne, %23, %c0_i32_17 : i32
    scf.if %24 {
      %c0_18 = arith.constant 0 : index
      %c0_19 = arith.constant 0 : index
      %25 = vector.load %arg9[%c0_18, %c0_19] : memref<8x128xf32, #tpu.memory_space<vmem>>, vector<8x128xf32>
      %c0_20 = arith.constant 0 : index
      %c0_21 = arith.constant 0 : index
      %26 = vector.load %arg6[%c0_20, %c0_21] : memref<1x128xf32, #tpu.memory_space<vmem>>, vector<1x128xf32>
      %27 = vector.broadcast %26 : vector<1x128xf32> to vector<8x128xf32>
      %28 = arith.addf %25, %27 : vector<8x128xf32>
      %c0_22 = arith.constant 0 : index
      %c0_23 = arith.constant 0 : index
      %29 = vector.load %arg7[%c0_22, %c0_23] : memref<8x128xf32, #tpu.memory_space<vmem>>, vector<8x128xf32>
      tpu.vector_store %arg7[%c0_22, %c0_23], %28 {strides = array<i32>} : memref<8x128xf32, #tpu.memory_space<vmem>>, vector<8x128xf32>,
    } else {
    }
    return
  }
  func.func @transform_0(%arg0: i32, %arg1: i32) -> (i32, i32) {
    %c0_i32 = arith.constant 0 : i32
    %c0_i32_0 = arith.constant 0 : i32
    return %arg0, %c0_i32 : i32, i32
  }
  func.func @transform_1(%arg0: i32, %arg1: i32) -> (i32, i32) {
    %c0_i32 = arith.constant 0 : i32
    %c0_i32_0 = arith.constant 0 : i32
    return %c0_i32, %arg1 : i32, i32
  }
  func.func @transform_2(%arg0: i32, %arg1: i32) -> (i32, i32) {
    %c0_i32 = arith.constant 0 : i32
    %c0_i32_0 = arith.constant 0 : i32
    return %c0_i32, %arg1 : i32, i32
  }
  func.func @transform_3(%arg0: i32, %arg1: i32) -> (i32, i32) {
    %c0_i32 = arith.constant 0 : i32
    %c0_i32_0 = arith.constant 0 : i32
    return %arg1, %c0_i32 : i32, i32
  }
  func.func @transform_4(%arg0: i32, %arg1: i32) -> (i32, i32) {
    %c0_i32 = arith.constant 0 : i32
    %c0_i32_0 = arith.constant 0 : i32
    %c0_i32_1 = arith.constant 0 : i32
    return %c0_i32, %c0_i32_0 : i32, i32
  }
  func.func @transform_5(%arg0: i32, %arg1: i32) -> (i32, i32) {
    %c0_i32 = arith.constant 0 : i32
    %c0_i32_0 = arith.constant 0 : i32
    return %arg0, %c0_i32 : i32, i32
  }
}

</mosaic_0001>

<bundles_post_ra>
// kernel: feed_forward.1
= control target key start
LH: loop header
LB: loop body
LE: loop exit
PB: predicated region body
PF: predicated region fallthrough
CT: control target
= control target key end

     0   :  { %10 = vsyncpa [#allocation5], 0  ;;  %s1287_s0 = inlined_call_operand.vmem [shape: f32[16,128], index: 0, kind: input, shape index: {}]   ;;  %s1288_s1 = inlined_call_operand.vmem [shape: f32[128,256], index: 1, kind: input, shape index: {}]   ;;  %s1289_s2 = inlined_call_operand.vmem [shape: f32[1,256], index: 2, kind: input, shape index: {}]   ;;  %s1290_s3 = inlined_call_operand.vmem [shape: f32[256,128], index: 3, kind: input, shape index: {}]   ;;  %s1291_s4 = inlined_call_operand.vmem [shape: f32[1,128], index: 4, kind: input, shape index: {}]   ;;  %s1292_s5 = inlined_call_operand.hbm [shape: f32[16,128], index: 5, kind: output, shape index: {}]  }
   0x1   :  { %12 = vsyncpa [#allocation5 + $0x1], 0  ;;  %s971_s18 = smov 0   ;;  %s973_s19 = smov 0  }
   0x2   :  { %s975_s20 = smov 0   ;;  %s977_s21 = smov 0  }
   0x3   :  { %s979_s22 = smov 0   ;;  %s981_s23 = smov 0  }
   0x4 LB: > { %s683_s24 = sadd.s32 4294967295, %s937_s23   ;;  %s684_s25 = sadd.s32 4294967294, %s937_s23   ;;  %s937_s23 = sphi %s981_s23, %s18_s23   ;;  %s933_s22 = sphi %s979_s22, %s1299_s22   ;;  %s929_s21 = sphi %s977_s21, %s1298_s21   ;;  %s925_s20 = sphi %s975_s20, %s1297_s20   ;;  %s921_s19 = sphi %s973_s19, %s1296_s19   ;;  %s917_s18 = sphi %s971_s18, %s1295_s18  }
   0x5   : > { %s30_s26 = sadd.s32 1, %s933_s22  ;;  %s162_s27 = sadd.s32 1, %s925_s20 }
   0x6   : > { %p32_p0 = scmp.ge.s32.totalorder %s30_s26, 2  ;;  %p172_p1 = scmp.ne.s32.totalorder %s925_s20, %s921_s19 }
   0x7   : > { %p173_p2 = scmp.eq.s32.totalorder %s683_s24, 1  ;;  %p178_p3 = scmp.ne.s32.totalorder %s921_s19, %s917_s18 }
   0x8   : > { %s1301_s26 = smov (%p32_p0, %s30_s26), 0  ;;  %p179_p5 = scmp.eq.s32.totalorder %s684_s25, 1 }
   0x9   : > { %p1011_p4 = por %p173_p2, %p172_p1  ;;  %s159_s29 = ssub.s32 %s933_s22, %s1301_s26 }
   0xa   : > { %p690_p6 = scmp.ge.s32.totalorder %s937_s23, 1  ;;  %p160_p7 = scmp.eq.s32.totalorder %s159_s29, 0 }
   0xb   : > { %p1018_p8 = por %p179_p5, %p178_p3  ;;  %p233_p9 = scmp.lt.s32.totalorder %s937_s23, 3 }
   0xc   : > { %s1024_s6 = scalar_select %p160_p7, %s925_s20, %s162_s27  }
   0xd   : > { %p234_p10 = pnand %p690_p6, %p233_p9 }
   0xe   : > { %p274_p11 = scmp.lt.s32.totalorder (!%p234_p10), %s929_s21, 1  ;;  %v318_v0 = vld [vmem:[%s1288_s1 + $0x8] sm:$0xff] (!%p234_p10)  ;;  %v320_v1 = vld [vmem:[%s1288_s1 + $0x18] sm:$0xff] (!%p234_p10)  ;;  %v317_v2 = vld [vmem:[%s1288_s1] sm:$0xff] (!%p234_p10)  ;;  %v939_v45 = vmov (!%p234_p10), 0.0   ;;  %s271_s7 = sand.u32 (!%p234_p10), 1, %s921_s19  }
   0xf   : > { %237 = sbr.rel (%p234_p10) target bundleno = 658 (0x292), region = 40  ;;  %v733_v3 = vpack.c.bf16 (!%p234_p10), %v320_v1, %v318_v0  ;;  %v319_v4 = vld [vmem:[%s1288_s1 + $0x10] sm:$0xff] (!%p234_p10)  ;;  %v322_v5 = vld [vmem:[%s1288_s1 + $0x28] sm:$0xff] (!%p234_p10)  ;;  %v324_v6 = vld [vmem:[%s1288_s1 + $0x38] sm:$0xff] (!%p234_p10)  ;;  %425 = vmatprep.mubr.f32.mxu0 (!%p234_p10), %v939_v45  ;;  %s691_s8 = sshll.u32 (!%p234_p10), %s271_s7, 3 }
  0x10   : > { %v735_v7 = vpack.c.bf16 (!%p234_p10), %v319_v4, %v317_v2  ;;  %v737_v8 = vpack.c.bf16 (!%p234_p10), %v324_v6, %v322_v5  ;;  %v321_v9 = vld [vmem:[%s1288_s1 + $0x20] sm:$0xff] (!%p234_p10)  ;;  %v323_v10 = vld [vmem:[%s1288_s1 + $0x30] sm:$0xff] (!%p234_p10)  ;;  %v326_v14 = vld [vmem:[%s1288_s1 + $0x48] sm:$0xff] (!%p234_p10)  ;;  %s695_s11 = sshll.u32 (!%p234_p10), %s929_s21, 7  ;;  %s561_s17 = scalar_lea.sflag (!%p234_p10), [#allocation5], %s271_s7 }
  0x11   : > { %734 = vmatprep.subr.bf16.mxu0 (!%p234_p10), %v733_v3  ;;  %v739_v11 = vpack.c.bf16 (!%p234_p10), %v323_v10, %v321_v9  ;;  %v328_v15 = vld [vmem:[%s1288_s1 + $0x58] sm:$0xff] (!%p234_p10)  ;;  %v325_v17 = vld [vmem:[%s1288_s1 + $0x40] sm:$0xff] (!%p234_p10)  ;;  %v327_v18 = vld [vmem:[%s1288_s1 + $0x50] sm:$0xff] (!%p234_p10)  ;;  %s1240_s16 = scalar_lea.hbm (!%p234_p10), %s1292_s5, %s695_s11 }
  0x12   : > { %736 = vmatpush1.bf16.msra.mxu0 (!%p234_p10), %v735_v7  ;;  %v741_v16 = vpack.c.bf16 (!%p234_p10), %v328_v15, %v326_v14  ;;  %v743_v19 = vpack.c.bf16 (!%p234_p10), %v327_v18, %v325_v17  ;;  %v330_v20 = vld [vmem:[%s1288_s1 + $0x68] sm:$0xff] (!%p234_p10)  ;;  %v332_v21 = vld [vmem:[%s1288_s1 + $0x78] sm:$0xff] (!%p234_p10)  ;;  %v329_v23 = vld [vmem:[%s1288_s1 + $0x60] sm:$0xff] (!%p234_p10) }
  0x13   : > { %738 = vmatprep.subr.bf16.mxu0 (!%p234_p10), %v737_v8  ;;  %v745_v22 = vpack.c.bf16 (!%p234_p10), %v332_v21, %v330_v20  ;;  %v331_v24 = vld [vmem:[%s1288_s1 + $0x70] sm:$0xff] (!%p234_p10)  ;;  %v334_v26 = vld [vmem:[%s1288_s1 + $0x88] sm:$0xff] (!%p234_p10)  ;;  %v336_v27 = vld [vmem:[%s1288_s1 + $0x98] sm:$0xff] (!%p234_p10) }
  0x14   : > { %v747_v25 = vpack.c.bf16 (!%p234_p10), %v331_v24, %v329_v23  ;;  %v749_v28 = vpack.c.bf16 (!%p234_p10), %v336_v27, %v334_v26  ;;  %v333_v29 = vld [vmem:[%s1288_s1 + $0x80] sm:$0xff] (!%p234_p10)  ;;  %v335_v30 = vld [vmem:[%s1288_s1 + $0x90] sm:$0xff] (!%p234_p10)  ;;  %v338_v32 = vld [vmem:[%s1288_s1 + $0xa8] sm:$0xff] (!%p234_p10) }
  0x15   : > { %v751_v31 = vpack.c.bf16 (!%p234_p10), %v335_v30, %v333_v29  ;;  %v340_v33 = vld [vmem:[%s1288_s1 + $0xb8] sm:$0xff] (!%p234_p10)  ;;  %v337_v35 = vld [vmem:[%s1288_s1 + $0xa0] sm:$0xff] (!%p234_p10)  ;;  %v339_v36 = vld [vmem:[%s1288_s1 + $0xb0] sm:$0xff] (!%p234_p10) }
  0x16   : > { %s275_s25 = scalar_select %p274_p11, %s929_s21, 1  ;;  %740 = vmatpush1.bf16.msra.mxu0 %v739_v11  ;;  %v753_v34 = vpack.c.bf16 %v340_v33, %v338_v32  ;;  %v755_v37 = vpack.c.bf16 %v339_v36, %v337_v35  ;;  %v342_v38 = vld [vmem:[%s1288_s1 + $0xc8] sm:$0xff]  ;;  %v344_v39 = vld [vmem:[%s1288_s1 + $0xd8] sm:$0xff]  ;;  %v341_v40 = vld [vmem:[%s1288_s1 + $0xc0] sm:$0xff] }
  0x17   : > { %742 = vmatprep.subr.bf16.mxu0 %v741_v16  ;;  %v757_v41 = vpack.c.bf16 %v344_v39, %v342_v38  ;;  %v343_v42 = vld [vmem:[%s1288_s1 + $0xd0] sm:$0xff]  ;;  %v346_v43 = vld [vmem:[%s1288_s1 + $0xe8] sm:$0xff]  ;;  %v348_v44 = vld [vmem:[%s1288_s1 + $0xf8] sm:$0xff]  ;;  %s940_s21 = smov [#allocation4]  }
  0x18   : > { %s692_s9 = sshll.u32 %s275_s25, 3  ;;  %v759_v46 = vpack.c.bf16 %v343_v42, %v341_v40  ;;  %v761_v47 = vpack.c.bf16 %v348_v44, %v346_v43  ;;  %v345_v48 = vld [vmem:[%s1288_s1 + $0xe0] sm:$0xff]  ;;  %v347_v49 = vld [vmem:[%s1288_s1 + $0xf0] sm:$0xff]  ;;  %v460_v52 = vld [vmem:[%s1290_s3 + $0x88] sm:$0xff]  ;;  %s863_s25 = sshll.u32 %s940_s21, 4  ;;  %s864_s25 = int_to_ptr.vmem [resolvable:$false] %s863_s25 }
  0x19   : > { %s277_s12 = scalar_lea.vmem %s1287_s0, %s692_s9  ;;  %v763_v50 = vpack.c.bf16 %v347_v49, %v345_v48  ;;  %v459_v51 = vld [vmem:[%s1290_s3 + $0x80] sm:$0xff]  ;;  %v444_v55 = vld [vmem:[%s1290_s3 + $0x8] sm:$0xff]  ;;  %v461_v56 = vld [vmem:[%s1290_s3 + $0x90] sm:$0xff]  ;;  %s865_s27 = scalar_lea.vmem %s864_s25, 256 }
  0x1a   : > { %v1055_v12 = vld [vmem:[%s277_s12] sm:$0xff]  ;;  %744 = vmatpush1.bf16.msra.mxu0 %v743_v19  ;;  %v765_v54 = vpack.c.bf16 %v460_v52, %v459_v51  ;;  %v462_v57 = vld [vmem:[%s1290_s3 + $0x98] sm:$0xff]  ;;  %v445_v60 = vld [vmem:[%s1290_s3 + $0x10] sm:$0xff]  ;;  %s273_s12 = scalar_lea.vmem [#allocation4], %s691_s8 }
  0x1b   : > { %300 = vadd.xlane.f32.xlu0 %v1055_v12  ;;  %v302_v13 = vmul.f32 %v1055_v12, %v1055_v12  ;;  %746 = vmatprep.subr.bf16.mxu0 %v745_v22  ;;  %v443_v53 = vld [vmem:[%s1290_s3] sm:$0xff]  ;;  %v769_v59 = vpack.c.bf16 %v462_v57, %v461_v56  ;;  %v446_v61 = vld [vmem:[%s1290_s3 + $0x18] sm:$0xff]  ;;  %v464_v63 = vld [vmem:[%s1290_s3 + $0xa8] sm:$0xff]  ;;  %s574_s13 = sshll.u32 %s273_s12, 4  ;;  %s1242_s13 = int_to_ptr.vmem [resolvable:$true] %s574_s13 }
  0x1c   : > { %v767_v58 = vpack.c.bf16 %v444_v55, %v443_v53  ;;  %v463_v62 = vld [vmem:[%s1290_s3 + $0xa0] sm:$0xff]  ;;  %766 = vmatprep.subr.bf16.mxu1 %v765_v54  ;;  %v771_v0 = vpack.c.bf16 %v446_v61, %v445_v60  ;;  %v448_v3 = vld [vmem:[%s1290_s3 + $0x28] sm:$0xff]  ;;  %v465_v17 = vld [vmem:[%s1290_s3 + $0xb0] sm:$0xff]  ;;  %s859_s24 = scalar_lea.vmem %s1242_s13, 128  ;;  %p866_p1 = scmp.lt.s32.totalorder %s1242_s13, %s864_s25 }
  0x1d   : > { %v773_v1 = vpack.c.bf16 %v464_v63, %v463_v62  ;;  %v447_v2 = vld [vmem:[%s1290_s3 + $0x20] sm:$0xff]  ;;  %v466_v18 = vld [vmem:[%s1290_s3 + $0xb8] sm:$0xff]  ;;  %v449_v20 = vld [vmem:[%s1290_s3 + $0x30] sm:$0xff]  ;;  %p860_p12 = scmp.ne.s32.totalorder %s1242_s13, %s859_s24  ;;  %p867_p2 = scmp.lt.s32.totalorder %s865_s27, %s859_s24 }
  0x1e   : > { %748 = vmatpush1.bf16.msra.mxu0 %v747_v25  ;;  %768 = vmatpush3.bf16.msra.mxu1 %v767_v58  ;;  %v775_v4 = vpack.c.bf16 %v448_v3, %v447_v2  ;;  %v777_v19 = vpack.c.bf16 %v466_v18, %v465_v17  ;;  %v467_v22 = vld [vmem:[%s1290_s3 + $0xc0] sm:$0xff]  ;;  %v468_v23 = vld [vmem:[%s1290_s3 + $0xc8] sm:$0xff]  ;;  %v470_v29 = vld [vmem:[%s1290_s3 + $0xd8] sm:$0xff] }
  0x1f   : > { %303 = vadd.xlane.f32.xlu0 %v302_v13  ;;  %750 = vmatprep.subr.bf16.mxu0 %v749_v28  ;;  %v781_v24 = vpack.c.bf16 %v468_v23, %v467_v22  ;;  %v451_v25 = vld [vmem:[%s1290_s3 + $0x40] sm:$0xff]  ;;  %v452_v26 = vld [vmem:[%s1290_s3 + $0x48] sm:$0xff]  ;;  %v469_v28 = vld [vmem:[%s1290_s3 + $0xd0] sm:$0xff]  ;;  %p861_p13 = pnand %p860_p12, %p1011_p4  ;;  %p868_p3 = por %p867_p2, %p866_p1 }
  0x20   : > { %770 = vmatprep.subr.bf16.mxu1 %v769_v59  ;;  %v783_v27 = vpack.c.bf16 %v452_v26, %v451_v25  ;;  %v785_v30 = vpack.c.bf16 %v470_v29, %v469_v28  ;;  %v454_v32 = vld [vmem:[%s1290_s3 + $0x58] sm:$0xff]  ;;  %v472_v35 = vld [vmem:[%s1290_s3 + $0xe8] sm:$0xff]  ;;  %v473_v40 = vld [vmem:[%s1290_s3 + $0xf0] sm:$0xff] }
  0x21   : > { %v456_v38 = vld [vmem:[%s1290_s3 + $0x68] sm:$0xff]  ;;  %v457_v43 = vld [vmem:[%s1290_s3 + $0x70] sm:$0xff]  ;;  %v458_v44 = vld [vmem:[%s1290_s3 + $0x78] sm:$0xff]  ;;  %p862_p0 = pneg %p861_p13 }
  0x22   : > { %752 = vmatpush1.bf16.msra.mxu0 %v751_v31  ;;  %772 = vmatpush3.bf16.msra.mxu1 %v771_v0  ;;  %v453_v31 = vld [vmem:[%s1290_s3 + $0x50] sm:$0xff]  ;;  %v795_v45 = vpack.c.bf16 %v458_v44, %v457_v43  ;;  %v349_v49 = vld [vmem:[%s1289_s2] sm:$0x3] }
  0x23   : > { %754 = vmatprep.subr.bf16.mxu0 %v753_v34  ;;  %774 = vmatprep.subr.bf16.mxu1 %v773_v1  ;;  %v787_v33 = vpack.c.bf16 %v454_v32, %v453_v31  ;;  %v471_v34 = vld [vmem:[%s1290_s3 + $0xe0] sm:$0xff]  ;;  %p869_p5 = pnand %p868_p3, %p862_p0 }
  0x24   : > { %v789_v36 = vpack.c.bf16 %v472_v35, %v471_v34 }
  0x26   : > { %756 = vmatpush1.bf16.msra.mxu0 %v755_v37  ;;  %776 = vmatpush3.bf16.msra.mxu1 %v775_v4  ;;  %v455_v37 = vld [vmem:[%s1290_s3 + $0x60] sm:$0xff] }
  0x27   : > { %758 = vmatprep.subr.bf16.mxu0 %v757_v41  ;;  %778 = vmatprep.subr.bf16.mxu1 %v777_v19  ;;  %v791_v39 = vpack.c.bf16 %v456_v38, %v455_v37  ;;  %v474_v41 = vld [vmem:[%s1290_s3 + $0xf8] sm:$0xff] }
  0x28   : > { %v793_v42 = vpack.c.bf16 %v474_v41, %v473_v40 }
  0x2a   : > { %760 = vmatpush1.bf16.msra.mxu0 %v759_v46  ;;  %v351_v46 = vlaneseq }
  0x2b   : > { %762 = vmatprep.subr.bf16.mxu0 %v761_v47 }
  0x2c   : > { %v352_v47 = vshrl.u32 %v351_v46, 7 }
  0x2e   : > { %764 = vmatpush1.bf16.msra.mxu0 %v763_v50  ;;  %v353_v48 = vsub.s32 0, %v352_v47  ;;  %v357_v50 = vsub.s32 1, %v352_v47 }
  0x30   : > { %v354_v51 = vrot.slane %v349_v49, %v353_v48  ;;  %v358_v52 = vrot.slane %v349_v49, %v357_v50 }
  0xa8   : > { %v301_v5 = vpop.xlane.xlu0 %300 }
  0xa9   : > { %v305_v6 = vmul.f32 0.0078125, %v301_v5  ;;  %v693_v5 = vld [vmem:[%s1291_s4] ss:$0 sm:$0xff] }
  0xab   : > { %v307_v8 = vmul.f32 %v305_v6, %v305_v6  ;;  %v310_v14 = vsub.f32 %v1055_v12, %v305_v6  ;;  %v450_v12 = vld [vmem:[%s1290_s3 + $0x38] sm:$0xff] }
  0xac   : > { %v304_v7 = vpop.xlane.xlu0 %303  ;;  %v779_v21 = vpack.c.bf16 %v450_v12, %v449_v20 }
  0xad   : > { %v306_v9 = vmul.f32 0.0078125, %v304_v7 }
  0xae   : > { %780 = vmatpush3.bf16.msra.mxu1 %v779_v21 }
  0xaf   : > { %v308_v10 = vsub.f32 %v306_v9, %v307_v8  ;;  %782 = vmatprep.subr.bf16.mxu1 %v781_v24 }
  0xb1   : > { %v309_v11 = vmax.f32 %v308_v10, 0.0 }
  0xb2   : > { %784 = vmatpush3.bf16.msra.mxu1 %v783_v27 }
  0xb3   : > { %v311_v13 = vadd.f32 1e-05, %v309_v11  ;;  %786 = vmatprep.subr.bf16.mxu1 %v785_v30 }
  0xb5   : > { %853 = vrsqrt.f32 %v311_v13 }
  0xb6   : > { %788 = vmatpush3.bf16.msra.mxu1 %v787_v33 }
  0xb7   : > { %790 = vmatprep.subr.bf16.mxu1 %v789_v36 }
  0xba   : > { %792 = vmatpush3.bf16.msra.mxu1 %v791_v39 }
  0xbb   : > { %794 = vmatprep.subr.bf16.mxu1 %v793_v42 }
  0xbe   : > { %796 = vmatpush3.bf16.msra.mxu1 %v795_v45 }
  0xbf   : > { %v854_v15 = vpop.eup %853 }
  0xc0   : > { %v313_v16 = vmul.f32 %v854_v15, %v310_v14 }
  0xc2   : > { %426 = vmatmul.mubr.f32.vlgmr.msra.gmra.mrb[0].mxu0 %v313_v16 }
 0x195   : > { %v427_v53 = vpop.f32.mrb[0].mxu0 }
 0x196   : > { %v428_v54 = vadd.f32 %v427_v53, %v354_v51  ;;  %v429_v55 = vpop.f32.mrb[1].mxu0 }
 0x197   : > { %v430_v56 = vadd.f32 %v429_v55, %v358_v52 }
 0x198   : > { %v434_v57 = vmul.f32 0.70710677, %v428_v54  ;;  %v432_v0 = vmul.f32 0.5, %v428_v54 }
 0x199   : > { %v435_v58 = vmul.f32 0.70710677, %v430_v56  ;;  %v433_v62 = vmul.f32 0.5, %v430_v56 }
 0x19a   : > { %855 = verf.f32 %v434_v57 }
 0x19b   : > { %857 = verf.f32 %v435_v58 }
 0x1a4   : > { %v856_v59 = vpop.eup %855 }
 0x1a5   : > { %v858_v60 = vpop.eup %857  ;;  %v438_v61 = vadd.f32 1.0, %v856_v59 }
 0x1a6   : > { %v439_v63 = vadd.f32 1.0, %v858_v60 }
 0x1a7   : > { %v440_v2 = vmul.f32 %v438_v61, %v432_v0 }
 0x1a8   : > { %v441_v1 = vmul.f32 %v439_v63, %v433_v62 }
 0x1aa   : > { %539 = vmatprep.mubr.f32.mxu1 %v441_v1 }
 0x1ab   : > { %540 = vmatmul.mubr.f32.vlgmr.msra.gmra.mrb[0].mxu1 %v440_v2 }
 0x27e   : > { %v730_v3 = vpop.f32.mrb[0].mxu1 }
 0x27f   : > { %v731_v4 = vpop.f32.mrb[1].mxu1 }
 0x280   : > { %v732_v6 = vadd.f32 %v731_v4, %v730_v3 }
 0x282   : > { %v558_v7 = vadd.f32 %v732_v6, %v693_v5 }
 0x284   : > { %559 = vst [vmem:[%s273_s12] sm:$0xff] %v558_v7 }
 0x285   : > { %872 = shalt.err (!%p869_p5)
}
 0x286   : > { %s873_s29 = scalar_lea.hbm %s1240_s16, 128  ;;  %s877_s9 = scalar_lea.hbm %s1292_s5, 256 }
 0x287   : > { %p874_p6 = scmp.ne.s32.totalorder %s1240_s16, %s873_s29  ;;  %p878_p10 = scmp.lt.u32.totalorder %s1240_s16, %s1292_s5 }
 0x288   : > { %p879_p11 = scmp.lt.u32.totalorder %s877_s9, %s873_s29  ;;  %p881_p13 = scmp.lt.u32.totalorder %s873_s29, %s1240_s16 }
 0x289   : > { %p875_p7 = pnand %p874_p6, %p1011_p4 }
 0x28a   : > { %p880_p12 = por %p879_p11, %p878_p10 }
 0x28b   : > { %p876_p9 = pneg %p875_p7 }
 0x28c   : > { %p882_p0 = por %p881_p13, %p880_p12 }
 0x28e   : > { %p883_p1 = pnand %p882_p0, %p876_p9 }
 0x290   : > { %886 = shalt.err (!%p883_p1)
}
 0x291   : > { %797 = dma.vmem_to_hbm [thread:$0]  (%p1011_p4), %s1242_s13, 128, %s1240_s16, %s561_s17  }
 0x292 PF: > { %p803_p2 = scmp.ge.s32.totalorder %s937_s23, 2  ;;  %s586_s12 = sand.u32 1, %s917_s18  }
 0x293   : > { %s587_s14 = scalar_lea.sflag [#allocation5], %s586_s12 }
 0x294   : > { %p800_p3 = pnand %p803_p2, %p1018_p8 }
 0x296   : > { %912 = dma.done.wait (!%p800_p3), %s587_s14, 128  }
 0x297   : > { %914 = vsyncadd (!%p800_p3), %s587_s14, 4294967168  ;;  %s18_s23 = sadd.s32 1, %s937_s23   ;;  %s1295_s18 = smov %s921_s19 }
 0x298   : > { %p15_p5 = scmp.ge.s32.totalorder %s18_s23, 4   ;;  %s1296_s19 = smov %s925_s20 }
 0x299   : > { %s1297_s20 = smov %s1024_s6  ;;  %s1298_s21 = smov %s933_s22 }
 0x29a   : > { %s1299_s22 = smov %s1301_s26  ;;  %17 = sbr.rel (!%p15_p5) target bundleno = 4 (0x4), region = 92 }
 0x2a1   :  { %592 = vsyncpa [#allocation5], 1 }
 0x2a2   :  { %594 = vsyncpa [#allocation5 + $0x1], 1 }

</bundles_post_ra>
